<compile_context>
chip_gen: v6e
topology: v6e:2x2x1
jax: 0.10.0
libtpu: 0.0.40
codegen_flags: <defaults>
</compile_context>

<pallas_src>
import jax
import jax.numpy as jnp
from jax.experimental import pallas as pl
from jax.experimental.pallas import tpu as pltpu


def _pad_to(n, m):
    return ((n + m - 1) // m) * m


def shallow_net_kernel(x_ref, w1_ref, b1_ref, w2_ref, b2_ref, o_ref):
    # Hot path: elementwise ReLU + two MXU matmuls, all on resident VMEM tiles.
    x = jnp.maximum(x_ref[...], 0.0)                                   # relu(x)
    h = jnp.dot(x, w1_ref[...], preferred_element_type=jnp.float32)    # x @ W1
    h = jnp.maximum(h + b1_ref[...], 0.0)                              # relu(+b1)
    y = jnp.dot(h, w2_ref[...], preferred_element_type=jnp.float32)    # h @ W2
    o_ref[...] = (y + b2_ref[...]).astype(o_ref.dtype)                 # + b2


def shallow_net_forward(x, w1, b1, w2, b2, *, block_b=2048):
    """x: [B, D_in] f32; w1: [D_in, H]; b1: [1|_, H]; w2: [H, D_out]; b2: [1|_, D_out].

    Returns [B, D_out] f32.  Weights are stored as [D_in, D_out] (transposed vs
    PyTorch's nn.Linear weight) so the kernel computes y = x @ W + b directly.
    No feature-dim padding is performed in HBM; only the batch axis is padded to
    a multiple of 8 and split into balanced tiles.
    """
    B, D_in = x.shape
    H = w1.shape[1]
    D_out = w2.shape[1]

    SUB = 8  # sublane width (second-to-last dim granularity)
    f32 = jnp.float32

    # Parameters at natural shapes (no padding, no extra HBM rewrite if already f32).
    w1_p = w1.astype(f32)
    b1_p = b1.reshape(1, H).astype(f32)
    w2_p = w2.astype(f32)
    b2_p = b2.reshape(1, D_out).astype(f32)

    # Balanced batch tiling: pad B only to a multiple of 8, then split into
    # n_steps tiles of equal (8-aligned) size.  Keep >= 2 steps when possible so
    # both v7x TensorCores get work; padding waste stays < n_steps * 8 rows.
    B_8 = _pad_to(B, SUB)
    n_steps = max(1, pl.cdiv(B_8, block_b))
    if B_8 >= 2 * SUB:
        n_steps = max(n_steps, 2)
    TB = _pad_to(pl.cdiv(B_8, n_steps), SUB)
    B_p = n_steps * TB

    x_f32 = x.astype(f32)
    if B_p == B:
        x_p = x_f32
    else:
        x_p = jnp.zeros((B_p, D_in), f32).at[:B, :].set(x_f32)

    grid = (n_steps,)

    # VMEM budget from the real footprint: double-buffered x/out tiles,
    # (default double-buffered) resident weights/biases, intermediate h.
    bytes_f32 = 4
    x_tile = TB * D_in * bytes_f32
    o_tile = TB * D_out * bytes_f32
    w_bytes = (D_in * H + H + H * D_out + D_out) * bytes_f32
    h_bytes = TB * H * bytes_f32
    footprint = 2 * (x_tile + o_tile) + 2 * w_bytes + 2 * h_bytes
    vmem_limit = int(min(56 * 1024 * 1024,
                         max(4 * 1024 * 1024, (footprint * 5) // 4)))

    out_p = pl.pallas_call(
        shallow_net_kernel,
        out_shape=jax.ShapeDtypeStruct((B_p, D_out), jnp.float32),
        grid_spec=pltpu.PrefetchScalarGridSpec(
            num_scalar_prefetch=0,
            grid=grid,
            in_specs=[
                # x tile walks the batch axis; last dim equals the full D_in.
                pl.BlockSpec((TB, D_in), lambda i: (i, 0)),
                # Weights / biases: constant index_map -> resident across grid,
                # blocks equal the full (unpadded) arrays.
                pl.BlockSpec((D_in, H), lambda i: (0, 0)),
                pl.BlockSpec((1, H), lambda i: (0, 0)),
                pl.BlockSpec((H, D_out), lambda i: (0, 0)),
                pl.BlockSpec((1, D_out), lambda i: (0, 0)),
            ],
            # Output emitted at its natural width; no padded columns, no trailing
            # feature-dim slice pass.
            out_specs=pl.BlockSpec((TB, D_out), lambda i: (i, 0)),
        ),
        compiler_params=pltpu.CompilerParams(
            # Batch rows are independent -> parallel (shards across v7x's 2 TCs;
            # measured-neutral on v5e/v6e).
            dimension_semantics=("parallel",),
            vmem_limit_bytes=vmem_limit,
        ),
    )(x_p, w1_p, b1_p, w2_p, b2_p)

    if B_p == B:
        return out_p
    return out_p[:B, :]


if __name__ == "__main__":
    # Modest shapes consistent with a shallow MLP forward; batch large enough to
    # exercise the balanced batch-tiled grid (512 rows -> 2 grid steps).
    B, D_IN, HIDDEN, D_OUT = 512, 16, 32, 8

    key = jax.random.PRNGKey(0)
    k_x, k_w1, k_b1, k_w2, k_b2 = jax.random.split(key, 5)

    # Deterministic synthetic parameters (no checkpoint load).
    x = jax.random.normal(k_x, (B, D_IN), dtype=jnp.float32)
    w1 = jax.random.normal(k_w1, (D_IN, HIDDEN), dtype=jnp.float32) * 0.1
    b1 = jax.random.normal(k_b1, (1, HIDDEN), dtype=jnp.float32) * 0.1
    w2 = jax.random.normal(k_w2, (HIDDEN, D_OUT), dtype=jnp.float32) * 0.1
    b2 = jax.random.normal(k_b2, (1, D_OUT), dtype=jnp.float32) * 0.1

    out = shallow_net_forward(x, w1, b1, w2, b2)
    out = jax.block_until_ready(out)

    # Pure-JAX reference check (same semantics as the PyTorch forward).
    xr = jnp.maximum(x, 0.0)
    hr = jnp.maximum(xr @ w1 + b1, 0.0)
    ref = hr @ w2 + b2
    assert out.shape == ref.shape, "shape mismatch vs reference"
    assert jnp.allclose(out, ref, atol=1e-4, rtol=1e-4), "mismatch vs reference"

    print("KERNEL_OK")
</pallas_src>

<mosaic_0001>
module attributes {stable_mosaic.version = 11 : i64} {
  func.func @shallow_net_kernel(%arg0: i32, %arg1: memref<256x16xf32, #tpu.memory_space<vmem>>, %arg2: memref<16x32xf32, #tpu.memory_space<vmem>>, %arg3: memref<1x32xf32, #tpu.memory_space<vmem>>, %arg4: memref<32x8xf32, #tpu.memory_space<vmem>>, %arg5: memref<1x8xf32, #tpu.memory_space<vmem>>, %arg6: memref<256x8xf32, #tpu.memory_space<vmem>>) attributes {dimension_semantics = [#tpu.dimension_semantics<parallel>], iteration_bounds = array<i64: 2>, scalar_prefetch = 0 : i64, scratch_operands = 0 : i64, tpu.core_type = #tpu.core_type<tc>, window_params = [{transform_indices = @transform_0, window_bounds = array<i64: 256, 16>}, {pipeline_mode = #tpu.pipeline_mode<synchronous>, transform_indices = @transform_1, window_bounds = array<i64: 16, 32>}, {pipeline_mode = #tpu.pipeline_mode<synchronous>, transform_indices = @transform_2, window_bounds = array<i64: 1, 32>}, {pipeline_mode = #tpu.pipeline_mode<synchronous>, transform_indices = @transform_3, window_bounds = array<i64: 32, 8>}, {pipeline_mode = #tpu.pipeline_mode<synchronous>, transform_indices = @transform_4, window_bounds = array<i64: 1, 8>}, {transform_indices = @transform_5, window_bounds = array<i64: 256, 8>}]} {
    %c0 = arith.constant 0 : index
    %c0_0 = arith.constant 0 : index
    %0 = vector.load %arg1[%c0, %c0_0] : memref<256x16xf32, #tpu.memory_space<vmem>>, vector<256x16xf32>
    %cst = arith.constant 0.000000e+00 : f32
    %1 = vector.broadcast %cst : f32 to vector<256x16xf32>
    %2 = arith.maximumf %0, %1 : vector<256x16xf32>
    %c0_1 = arith.constant 0 : index
    %c0_2 = arith.constant 0 : index
    %3 = vector.load %arg2[%c0_1, %c0_2] : memref<16x32xf32, #tpu.memory_space<vmem>>, vector<16x32xf32>
    %cst_3 = arith.constant dense<0.000000e+00> : vector<256x32xf32>
    %4 = tpu.matmul %2, %3, %cst_3 {dimension_numbers = #tpu.dot_dimension_numbers<[1], [0], [0], [1], [0, 0, 1, 1], [], []>} : vector<256x16xf32>, vector<16x32xf32>, vector<256x32xf32> -> vector<256x32xf32>
    %c0_4 = arith.constant 0 : index
    %c0_5 = arith.constant 0 : index
    %5 = vector.load %arg3[%c0_4, %c0_5] : memref<1x32xf32, #tpu.memory_space<vmem>>, vector<1x32xf32>
    %6 = vector.broadcast %5 : vector<1x32xf32> to vector<256x32xf32>
    %7 = arith.addf %4, %6 : vector<256x32xf32>
    %cst_6 = arith.constant 0.000000e+00 : f32
    %8 = vector.broadcast %cst_6 : f32 to vector<256x32xf32>
    %9 = arith.maximumf %7, %8 : vector<256x32xf32>
    %c0_7 = arith.constant 0 : index
    %c0_8 = arith.constant 0 : index
    %10 = vector.load %arg4[%c0_7, %c0_8] : memref<32x8xf32, #tpu.memory_space<vmem>>, vector<32x8xf32>
    %cst_9 = arith.constant dense<0.000000e+00> : vector<256x8xf32>
    %11 = tpu.matmul %9, %10, %cst_9 {dimension_numbers = #tpu.dot_dimension_numbers<[1], [0], [0], [1], [0, 0, 1, 1], [], []>} : vector<256x32xf32>, vector<32x8xf32>, vector<256x8xf32> -> vector<256x8xf32>
    %c0_10 = arith.constant 0 : index
    %c0_11 = arith.constant 0 : index
    %12 = vector.load %arg5[%c0_10, %c0_11] : memref<1x8xf32, #tpu.memory_space<vmem>>, vector<1x8xf32>
    %13 = vector.broadcast %12 : vector<1x8xf32> to vector<256x8xf32>
    %14 = arith.addf %11, %13 : vector<256x8xf32>
    %c0_12 = arith.constant 0 : index
    %c0_13 = arith.constant 0 : index
    %15 = vector.load %arg6[%c0_12, %c0_13] : memref<256x8xf32, #tpu.memory_space<vmem>>, vector<256x8xf32>
    tpu.vector_store %arg6[%c0_12, %c0_13], %14 {strides = array<i32>} : memref<256x8xf32, #tpu.memory_space<vmem>>, vector<256x8xf32>,
    return
  }
  func.func @transform_0(%arg0: i32) -> (i32, i32) {
    %c0_i32 = arith.constant 0 : i32
    %c0_i32_0 = arith.constant 0 : i32
    return %arg0, %c0_i32 : i32, i32
  }
  func.func @transform_1(%arg0: i32) -> (i32, i32) {
    %c0_i32 = arith.constant 0 : i32
    %c0_i32_0 = arith.constant 0 : i32
    %c0_i32_1 = arith.constant 0 : i32
    return %c0_i32, %c0_i32_0 : i32, i32
  }
  func.func @transform_2(%arg0: i32) -> (i32, i32) {
    %c0_i32 = arith.constant 0 : i32
    %c0_i32_0 = arith.constant 0 : i32
    %c0_i32_1 = arith.constant 0 : i32
    return %c0_i32, %c0_i32_0 : i32, i32
  }
  func.func @transform_3(%arg0: i32) -> (i32, i32) {
    %c0_i32 = arith.constant 0 : i32
    %c0_i32_0 = arith.constant 0 : i32
    %c0_i32_1 = arith.constant 0 : i32
    return %c0_i32, %c0_i32_0 : i32, i32
  }
  func.func @transform_4(%arg0: i32) -> (i32, i32) {
    %c0_i32 = arith.constant 0 : i32
    %c0_i32_0 = arith.constant 0 : i32
    %c0_i32_1 = arith.constant 0 : i32
    return %c0_i32, %c0_i32_0 : i32, i32
  }
  func.func @transform_5(%arg0: i32) -> (i32, i32) {
    %c0_i32 = arith.constant 0 : i32
    %c0_i32_0 = arith.constant 0 : i32
    return %arg0, %c0_i32 : i32, i32
  }
}

</mosaic_0001>

<bundles_post_ra>
// kernel: tpu_custom_call.1
= control target key start
LH: loop header
LB: loop body
LE: loop exit
PB: predicated region body
PF: predicated region fallthrough
CT: control target
= control target key end

     0   :  { %s1378_s18 = smov 0   ;;  %s1658_s0 = inlined_call_operand.vmem [shape: f32[512,16], index: 0, kind: input, shape index: {}]   ;;  %s1659_s1 = inlined_call_operand.vmem [shape: f32[16,32], index: 1, kind: input, shape index: {}]   ;;  %s1660_s2 = inlined_call_operand.vmem [shape: f32[1,32], index: 2, kind: input, shape index: {}]   ;;  %s1661_s3 = inlined_call_operand.vmem [shape: f32[32,8], index: 3, kind: input, shape index: {}]   ;;  %s1662_s4 = inlined_call_operand.vmem [shape: f32[1,8], index: 4, kind: input, shape index: {}]   ;;  %s1663_s5 = inlined_call_operand.vmem [shape: f32[512,8], index: 5, kind: output, shape index: {}]  }
   0x1 LB: > { %s1077_s19 = sadd.s32 4294967295, %s1346_s18   ;;  %p1081_p0 = scmp.ge.s32.totalorder %s1346_s18, 1  ;;  %s1346_s18 = sphi %s1378_s18, %s15_s18  }
   0x2   : > { %p188_p1 = scmp.lt.s32.totalorder %s1346_s18, 3 }
   0x4   : > { %p189_p2 = pnand %p1081_p0, %p188_p1 }
   0x5   : > { %s1082_s24 = sshll.u32 (!%p189_p2), %s1077_s19, 5 }
   0x6   : > { %192 = sbr.rel (%p189_p2) target bundleno = 476 (0x1dc), region = 40  ;;  %p217_p3 = scmp.lt.s32.totalorder (!%p189_p2), %s1082_s24, 63 }
   0xb   : > { %v293_v0 = vld [vmem:[%s1659_s1 + $0x8] sm:$0xff]  ;;  %v292_v1 = vld [vmem:[%s1659_s1] sm:$0xff]  ;;  %s1665_s24 = smov (!%p217_p3, %s1082_s24), 63  ;;  %vm301_vm0 = vcmask 130048   ;;  %vm666_vm1 = vcmask 261120   ;;  %vm988_vm2 = vcmask 64512  }
   0xc   : > { %1224 = vmatprep.subr.mxu0 %v293_v0  ;;  %s1083_s25 = sshll.u32 %s1665_s24, 3 }
   0xd   : > { %1225 = vmatpush3.msra.mxu0 %v293_v0  ;;  %s1400_s28 = scalar_lea.vmem %s1658_s0, %s1083_s25  ;;  %s1557_s19 = scalar_lea.vmem %s1663_s5, %s1083_s25 }
   0xe   : > { %1226 = vmatprep.subr.mxu0 %v292_v1  ;;  %v228_v2 = vld [vmem:[%s1400_s28] sm:$0xff]  ;;  %v229_v3 = vld [vmem:[%s1400_s28 + $0x8] sm:$0xff]  ;;  %v230_v4 = vld [vmem:[%s1400_s28 + $0x10] sm:$0xff] }
   0xf   : > { %1227 = vmatpush3.msra.mxu0 %v292_v1  ;;  %v260_v5 = vmax.f32 %v228_v2, 0.0  ;;  %v261_v6 = vmax.f32 %v229_v3, 0.0  ;;  %v262_v7 = vmax.f32 %v230_v4, 0.0  ;;  %v231_v8 = vld [vmem:[%s1400_s28 + $0x18] sm:$0xff]  ;;  %v232_v9 = vld [vmem:[%s1400_s28 + $0x20] sm:$0xff]  ;;  %v233_v12 = vld [vmem:[%s1400_s28 + $0x28] sm:$0xff] }
  0x10   : > { %v263_v10 = vmax.f32 %v231_v8, 0.0  ;;  %v264_v11 = vmax.f32 %v232_v9, 0.0  ;;  %v234_v13 = vld [vmem:[%s1400_s28 + $0x30] sm:$0xff]  ;;  %v265_v14 = vmax.f32 %v233_v12, 0.0  ;;  %v235_v16 = vld [vmem:[%s1400_s28 + $0x38] sm:$0xff]  ;;  %v236_v17 = vld [vmem:[%s1400_s28 + $0x40] sm:$0xff] }
  0x11   : > { %1228 = vmatprep.mubr.msk.f32.mxu0 %vm301_vm0, %v260_v5  ;;  %v266_v15 = vmax.f32 %v234_v13, 0.0  ;;  %v267_v18 = vmax.f32 %v235_v16, 0.0  ;;  %v268_v19 = vmax.f32 %v236_v17, 0.0  ;;  %v237_v20 = vld [vmem:[%s1400_s28 + $0x48] sm:$0xff]  ;;  %v238_v21 = vld [vmem:[%s1400_s28 + $0x50] sm:$0xff]  ;;  %v239_v24 = vld [vmem:[%s1400_s28 + $0x58] sm:$0xff] }
  0x12   : > { %1229 = vmatmul.mubr.msk.f32.vlgmr.msra.gmra.mxu0 %vm301_vm0, %v261_v6  ;;  %v269_v22 = vmax.f32 %v237_v20, 0.0  ;;  %v270_v23 = vmax.f32 %v238_v21, 0.0  ;;  %v240_v25 = vld [vmem:[%s1400_s28 + $0x60] sm:$0xff]  ;;  %v271_v26 = vmax.f32 %v239_v24, 0.0  ;;  %v241_v28 = vld [vmem:[%s1400_s28 + $0x68] sm:$0xff]  ;;  %v242_v29 = vld [vmem:[%s1400_s28 + $0x70] sm:$0xff] }
  0x13   : > { %1231 = vmatprep.mubr.msk.f32.mxu0 %vm301_vm0, %v262_v7  ;;  %v272_v27 = vmax.f32 %v240_v25, 0.0  ;;  %v273_v30 = vmax.f32 %v241_v28, 0.0  ;;  %v274_v31 = vmax.f32 %v242_v29, 0.0  ;;  %v243_v32 = vld [vmem:[%s1400_s28 + $0x78] sm:$0xff]  ;;  %v244_v33 = vld [vmem:[%s1400_s28 + $0x80] sm:$0xff]  ;;  %v245_v36 = vld [vmem:[%s1400_s28 + $0x88] sm:$0xff] }
  0x14   : > { %v275_v34 = vmax.f32 %v243_v32, 0.0  ;;  %v276_v35 = vmax.f32 %v244_v33, 0.0  ;;  %v246_v37 = vld [vmem:[%s1400_s28 + $0x90] sm:$0xff]  ;;  %v277_v38 = vmax.f32 %v245_v36, 0.0  ;;  %v247_v40 = vld [vmem:[%s1400_s28 + $0x98] sm:$0xff]  ;;  %v248_v41 = vld [vmem:[%s1400_s28 + $0xa0] sm:$0xff] }
  0x15   : > { %v278_v39 = vmax.f32 %v246_v37, 0.0  ;;  %v279_v42 = vmax.f32 %v247_v40, 0.0  ;;  %v280_v43 = vmax.f32 %v248_v41, 0.0  ;;  %v249_v44 = vld [vmem:[%s1400_s28 + $0xa8] sm:$0xff]  ;;  %v250_v45 = vld [vmem:[%s1400_s28 + $0xb0] sm:$0xff]  ;;  %v251_v48 = vld [vmem:[%s1400_s28 + $0xb8] sm:$0xff] }
  0x16   : > { %1232 = vmatmul.mubr.msk.f32.gmra.mxu0 %vm301_vm0, %v263_v10  ;;  %v281_v46 = vmax.f32 %v249_v44, 0.0  ;;  %v282_v47 = vmax.f32 %v250_v45, 0.0  ;;  %v252_v49 = vld [vmem:[%s1400_s28 + $0xc0] sm:$0xff]  ;;  %v283_v50 = vmax.f32 %v251_v48, 0.0  ;;  %v253_v52 = vld [vmem:[%s1400_s28 + $0xc8] sm:$0xff]  ;;  %v254_v53 = vld [vmem:[%s1400_s28 + $0xd0] sm:$0xff] }
  0x17   : > { %1234 = vmatprep.mubr.msk.f32.mxu0 %vm301_vm0, %v264_v11  ;;  %v284_v51 = vmax.f32 %v252_v49, 0.0  ;;  %v285_v54 = vmax.f32 %v253_v52, 0.0  ;;  %v286_v55 = vmax.f32 %v254_v53, 0.0  ;;  %v255_v56 = vld [vmem:[%s1400_s28 + $0xd8] sm:$0xff]  ;;  %v256_v57 = vld [vmem:[%s1400_s28 + $0xe0] sm:$0xff]  ;;  %v257_v60 = vld [vmem:[%s1400_s28 + $0xe8] sm:$0xff] }
  0x18   : > { %v287_v58 = vmax.f32 %v255_v56, 0.0  ;;  %v288_v59 = vmax.f32 %v256_v57, 0.0  ;;  %v258_v61 = vld [vmem:[%s1400_s28 + $0xf0] sm:$0xff]  ;;  %v289_v62 = vmax.f32 %v257_v60, 0.0  ;;  %v259_v0 = vld [vmem:[%s1400_s28 + $0xf8] sm:$0xff]  ;;  %v656_v4 = vld [vmem:[%s1661_s3 + $0x8] sm:$0xff] }
  0x19   : > { %v290_v63 = vmax.f32 %v258_v61, 0.0  ;;  %v291_v1 = vmax.f32 %v259_v0, 0.0  ;;  %v658_v2 = vld [vmem:[%s1661_s3 + $0x18] sm:$0xff]  ;;  %v657_v3 = vld [vmem:[%s1661_s3 + $0x10] sm:$0xff]  ;;  %v655_v5 = vld [vmem:[%s1661_s3] sm:$0xff] }
  0x1a   : > { %1235 = vmatmul.mubr.msk.f32.gmra.mxu0 %vm301_vm0, %v265_v14  ;;  %1276 = vmatprep.subr.mxu1 %v658_v2  ;;  %v1481_v6 = vld [vmem:[%s1660_s2] ss:$0 sm:$0xff] }
  0x1b   : > { %1237 = vmatprep.mubr.msk.f32.mxu0 %vm301_vm0, %v266_v15  ;;  %1277 = vmatpush3.msra.mxu1 %v658_v2 }
  0x1c   : > { %1278 = vmatprep.subr.mxu1 %v657_v3 }
  0x1d   : > { %1279 = vmatpush3.msra.mxu1 %v657_v3 }
  0x1e   : > { %1238 = vmatmul.mubr.msk.f32.gmra.mxu0 %vm301_vm0, %v267_v18  ;;  %1280 = vmatprep.subr.mxu1 %v656_v4 }
  0x1f   : > { %1240 = vmatprep.mubr.msk.f32.mxu0 %vm301_vm0, %v268_v19  ;;  %1281 = vmatpush3.msra.mxu1 %v656_v4 }
  0x20   : > { %1282 = vmatprep.subr.mxu1 %v655_v5 }
  0x21   : > { %1283 = vmatpush3.msra.mxu1 %v655_v5 }
  0x22   : > { %1241 = vmatmul.mubr.msk.f32.gmra.mxu0 %vm301_vm0, %v269_v22 }
  0x23   : > { %1243 = vmatprep.mubr.msk.f32.mxu0 %vm301_vm0, %v270_v23 }
  0x26   : > { %1244 = vmatmul.mubr.msk.f32.gmra.mxu0 %vm301_vm0, %v271_v26 }
  0x27   : > { %1246 = vmatprep.mubr.msk.f32.mxu0 %vm301_vm0, %v272_v27 }
  0x2a   : > { %1247 = vmatmul.mubr.msk.f32.gmra.mxu0 %vm301_vm0, %v273_v30 }
  0x2b   : > { %1249 = vmatprep.mubr.msk.f32.mxu0 %vm301_vm0, %v274_v31 }
  0x2e   : > { %1250 = vmatmul.mubr.msk.f32.gmra.mxu0 %vm301_vm0, %v275_v34 }
  0x2f   : > { %1252 = vmatprep.mubr.msk.f32.mxu0 %vm301_vm0, %v276_v35 }
  0x32   : > { %1253 = vmatmul.mubr.msk.f32.gmra.mxu0 %vm301_vm0, %v277_v38 }
  0x33   : > { %1255 = vmatprep.mubr.msk.f32.mxu0 %vm301_vm0, %v278_v39 }
  0x36   : > { %1256 = vmatmul.mubr.msk.f32.gmra.mxu0 %vm301_vm0, %v279_v42 }
  0x37   : > { %1258 = vmatprep.mubr.msk.f32.mxu0 %vm301_vm0, %v280_v43 }
  0x3a   : > { %1259 = vmatmul.mubr.msk.f32.gmra.mxu0 %vm301_vm0, %v281_v46 }
  0x3b   : > { %1261 = vmatprep.mubr.msk.f32.mxu0 %vm301_vm0, %v282_v47 }
  0x3e   : > { %1262 = vmatmul.mubr.msk.f32.gmra.mxu0 %vm301_vm0, %v283_v50 }
  0x3f   : > { %1264 = vmatprep.mubr.msk.f32.mxu0 %vm301_vm0, %v284_v51 }
  0x42   : > { %1265 = vmatmul.mubr.msk.f32.gmra.mxu0 %vm301_vm0, %v285_v54 }
  0x43   : > { %1267 = vmatprep.mubr.msk.f32.mxu0 %vm301_vm0, %v286_v55 }
  0x46   : > { %1268 = vmatmul.mubr.msk.f32.gmra.mxu0 %vm301_vm0, %v287_v58 }
  0x47   : > { %1270 = vmatprep.mubr.msk.f32.mxu0 %vm301_vm0, %v288_v59 }
  0x4a   : > { %1271 = vmatmul.mubr.msk.f32.gmra.mxu0 %vm301_vm0, %v289_v62 }
  0x4b   : > { %1273 = vmatprep.mubr.msk.f32.mxu0 %vm301_vm0, %v290_v63 }
  0x4e   : > { %1274 = vmatmul.mubr.msk.f32.gmra.mxu0 %vm301_vm0, %v291_v1 }
  0xd2   : > { %v1230_v7 = vpop.f32.mrf.mxu0 }
  0xd3   : > { %v470_v8 = vadd.f32 %v1230_v7, %v1481_v6 }
  0xd4   : > { %v464_v9 = vpop.f32.mrf.mxu0 }
  0xd5   : > { %v465_v10 = vadd.f32 %v1481_v6, %v464_v9  ;;  %v624_v13 = vmax.f32 %v470_v8, 0.0 }
  0xd6   : > { %v1233_v11 = vpop.f32.mrf.mxu0 }
  0xd7   : > { %v623_v12 = vmax.f32 %v465_v10, 0.0  ;;  %v480_v14 = vadd.f32 %v1233_v11, %v1481_v6 }
  0xd8   : > { %v474_v15 = vpop.f32.mrf.mxu0 }
  0xd9   : > { %v475_v16 = vadd.f32 %v1481_v6, %v474_v15  ;;  %1284 = vmatprep.mubr.msk.f32.mxu1 %vm666_vm1, %v623_v12  ;;  %v626_v19 = vmax.f32 %v480_v14, 0.0 }
  0xda   : > { %v1236_v17 = vpop.f32.mrf.mxu0  ;;  %1285 = vmatmul.mubr.msk.f32.vlgmr.msra.gmra.mxu1 %vm666_vm1, %v624_v13 }
  0xdb   : > { %v625_v18 = vmax.f32 %v475_v16, 0.0  ;;  %v490_v20 = vadd.f32 %v1236_v17, %v1481_v6 }
  0xdc   : > { %v484_v21 = vpop.f32.mrf.mxu0 }
  0xdd   : > { %v485_v22 = vadd.f32 %v1481_v6, %v484_v21  ;;  %1287 = vmatprep.mubr.msk.f32.mxu1 %vm666_vm1, %v625_v18  ;;  %v628_v25 = vmax.f32 %v490_v20, 0.0 }
  0xde   : > { %v1239_v23 = vpop.f32.mrf.mxu0  ;;  %1288 = vmatmul.mubr.msk.f32.gmra.mxu1 %vm666_vm1, %v626_v19 }
  0xdf   : > { %v627_v24 = vmax.f32 %v485_v22, 0.0  ;;  %v500_v26 = vadd.f32 %v1239_v23, %v1481_v6 }
  0xe0   : > { %v494_v27 = vpop.f32.mrf.mxu0 }
  0xe1   : > { %v495_v28 = vadd.f32 %v1481_v6, %v494_v27  ;;  %1290 = vmatprep.mubr.msk.f32.mxu1 %vm666_vm1, %v627_v24  ;;  %v630_v31 = vmax.f32 %v500_v26, 0.0 }
  0xe2   : > { %v1242_v29 = vpop.f32.mrf.mxu0  ;;  %1291 = vmatmul.mubr.msk.f32.gmra.mxu1 %vm666_vm1, %v628_v25 }
  0xe3   : > { %v629_v30 = vmax.f32 %v495_v28, 0.0  ;;  %v510_v32 = vadd.f32 %v1242_v29, %v1481_v6 }
  0xe4   : > { %v504_v33 = vpop.f32.mrf.mxu0 }
  0xe5   : > { %v505_v34 = vadd.f32 %v1481_v6, %v504_v33  ;;  %1293 = vmatprep.mubr.msk.f32.mxu1 %vm666_vm1, %v629_v30  ;;  %v632_v37 = vmax.f32 %v510_v32, 0.0 }
  0xe6   : > { %v1245_v35 = vpop.f32.mrf.mxu0  ;;  %1294 = vmatmul.mubr.msk.f32.gmra.mxu1 %vm666_vm1, %v630_v31 }
  0xe7   : > { %v631_v36 = vmax.f32 %v505_v34, 0.0  ;;  %v520_v38 = vadd.f32 %v1245_v35, %v1481_v6 }
  0xe8   : > { %v514_v39 = vpop.f32.mrf.mxu0 }
  0xe9   : > { %v515_v40 = vadd.f32 %v1481_v6, %v514_v39  ;;  %1296 = vmatprep.mubr.msk.f32.mxu1 %vm666_vm1, %v631_v36  ;;  %v634_v43 = vmax.f32 %v520_v38, 0.0 }
  0xea   : > { %v1248_v41 = vpop.f32.mrf.mxu0  ;;  %1297 = vmatmul.mubr.msk.f32.gmra.mxu1 %vm666_vm1, %v632_v37 }
  0xeb   : > { %v633_v42 = vmax.f32 %v515_v40, 0.0  ;;  %v530_v44 = vadd.f32 %v1248_v41, %v1481_v6  ;;  %v1550_v40 = vld [vmem:[%s1662_s4] ss:$0 sm:$0xff] }
  0xec   : > { %v524_v45 = vpop.f32.mrf.mxu0 }
  0xed   : > { %v525_v46 = vadd.f32 %v1481_v6, %v524_v45  ;;  %1299 = vmatprep.mubr.msk.f32.mxu1 %vm666_vm1, %v633_v42  ;;  %v636_v49 = vmax.f32 %v530_v44, 0.0 }
  0xee   : > { %v1251_v47 = vpop.f32.mrf.mxu0  ;;  %1300 = vmatmul.mubr.msk.f32.gmra.mxu1 %vm666_vm1, %v634_v43 }
  0xef   : > { %v635_v48 = vmax.f32 %v525_v46, 0.0  ;;  %v540_v50 = vadd.f32 %v1251_v47, %v1481_v6 }
  0xf0   : > { %v534_v51 = vpop.f32.mrf.mxu0 }
  0xf1   : > { %v535_v52 = vadd.f32 %v1481_v6, %v534_v51  ;;  %1302 = vmatprep.mubr.msk.f32.mxu1 %vm666_vm1, %v635_v48  ;;  %v638_v55 = vmax.f32 %v540_v50, 0.0 }
  0xf2   : > { %v1254_v53 = vpop.f32.mrf.mxu0  ;;  %1303 = vmatmul.mubr.msk.f32.gmra.mxu1 %vm666_vm1, %v636_v49 }
  0xf3   : > { %v637_v54 = vmax.f32 %v535_v52, 0.0  ;;  %v550_v56 = vadd.f32 %v1254_v53, %v1481_v6 }
  0xf4   : > { %v544_v57 = vpop.f32.mrf.mxu0 }
  0xf5   : > { %v545_v58 = vadd.f32 %v1481_v6, %v544_v57  ;;  %1305 = vmatprep.mubr.msk.f32.mxu1 %vm666_vm1, %v637_v54  ;;  %v640_v61 = vmax.f32 %v550_v56, 0.0 }
  0xf6   : > { %v1257_v59 = vpop.f32.mrf.mxu0  ;;  %1306 = vmatmul.mubr.msk.f32.gmra.mxu1 %vm666_vm1, %v638_v55 }
  0xf7   : > { %v639_v60 = vmax.f32 %v545_v58, 0.0  ;;  %v560_v62 = vadd.f32 %v1257_v59, %v1481_v6 }
  0xf8   : > { %v554_v63 = vpop.f32.mrf.mxu0 }
  0xf9   : > { %v555_v0 = vadd.f32 %v1481_v6, %v554_v63  ;;  %1308 = vmatprep.mubr.msk.f32.mxu1 %vm666_vm1, %v639_v60  ;;  %v642_v3 = vmax.f32 %v560_v62, 0.0 }
  0xfa   : > { %v1260_v1 = vpop.f32.mrf.mxu0  ;;  %1309 = vmatmul.mubr.msk.f32.gmra.mxu1 %vm666_vm1, %v640_v61 }
  0xfb   : > { %v641_v2 = vmax.f32 %v555_v0, 0.0  ;;  %v570_v4 = vadd.f32 %v1260_v1, %v1481_v6 }
  0xfc   : > { %v564_v5 = vpop.f32.mrf.mxu0 }
  0xfd   : > { %v565_v7 = vadd.f32 %v1481_v6, %v564_v5  ;;  %1311 = vmatprep.mubr.msk.f32.mxu1 %vm666_vm1, %v641_v2  ;;  %v644_v10 = vmax.f32 %v570_v4, 0.0 }
  0xfe   : > { %v1263_v8 = vpop.f32.mrf.mxu0  ;;  %1312 = vmatmul.mubr.msk.f32.gmra.mxu1 %vm666_vm1, %v642_v3 }
  0xff   : > { %v643_v9 = vmax.f32 %v565_v7, 0.0  ;;  %v580_v11 = vadd.f32 %v1263_v8, %v1481_v6 }
 0x100   : > { %v574_v12 = vpop.f32.mrf.mxu0 }
 0x101   : > { %v575_v13 = vadd.f32 %v1481_v6, %v574_v12  ;;  %1314 = vmatprep.mubr.msk.f32.mxu1 %vm666_vm1, %v643_v9  ;;  %v646_v16 = vmax.f32 %v580_v11, 0.0 }
 0x102   : > { %v1266_v14 = vpop.f32.mrf.mxu0  ;;  %1315 = vmatmul.mubr.msk.f32.gmra.mxu1 %vm666_vm1, %v644_v10 }
 0x103   : > { %v645_v15 = vmax.f32 %v575_v13, 0.0  ;;  %v590_v17 = vadd.f32 %v1266_v14, %v1481_v6 }
 0x104   : > { %v584_v18 = vpop.f32.mrf.mxu0 }
 0x105   : > { %v585_v19 = vadd.f32 %v1481_v6, %v584_v18  ;;  %1317 = vmatprep.mubr.msk.f32.mxu1 %vm666_vm1, %v645_v15  ;;  %v648_v22 = vmax.f32 %v590_v17, 0.0 }
 0x106   : > { %v1269_v20 = vpop.f32.mrf.mxu0  ;;  %1318 = vmatmul.mubr.msk.f32.gmra.mxu1 %vm666_vm1, %v646_v16 }
 0x107   : > { %v647_v21 = vmax.f32 %v585_v19, 0.0  ;;  %v600_v23 = vadd.f32 %v1269_v20, %v1481_v6 }
 0x108   : > { %v594_v24 = vpop.f32.mrf.mxu0 }
 0x109   : > { %v595_v25 = vadd.f32 %v1481_v6, %v594_v24  ;;  %1320 = vmatprep.mubr.msk.f32.mxu1 %vm666_vm1, %v647_v21  ;;  %v650_v28 = vmax.f32 %v600_v23, 0.0 }
 0x10a   : > { %v1272_v26 = vpop.f32.mrf.mxu0  ;;  %1321 = vmatmul.mubr.msk.f32.gmra.mxu1 %vm666_vm1, %v648_v22 }
 0x10b   : > { %v649_v27 = vmax.f32 %v595_v25, 0.0  ;;  %v610_v29 = vadd.f32 %v1272_v26, %v1481_v6 }
 0x10c   : > { %v604_v30 = vpop.f32.mrf.mxu0 }
 0x10d   : > { %v605_v31 = vadd.f32 %v1481_v6, %v604_v30  ;;  %1323 = vmatprep.mubr.msk.f32.mxu1 %vm666_vm1, %v649_v27  ;;  %v652_v34 = vmax.f32 %v610_v29, 0.0 }
 0x10e   : > { %v1275_v32 = vpop.f32.mrf.mxu0  ;;  %1324 = vmatmul.mubr.msk.f32.gmra.mxu1 %vm666_vm1, %v650_v28 }
 0x10f   : > { %v651_v33 = vmax.f32 %v605_v31, 0.0  ;;  %v620_v35 = vadd.f32 %v1275_v32, %v1481_v6 }
 0x110   : > { %v614_v36 = vpop.f32.mrf.mxu0 }
 0x111   : > { %v615_v37 = vadd.f32 %v1481_v6, %v614_v36  ;;  %1326 = vmatprep.mubr.msk.f32.mxu1 %vm666_vm1, %v651_v33  ;;  %v654_v39 = vmax.f32 %v620_v35, 0.0 }
 0x112   : > { %1327 = vmatmul.mubr.msk.f32.gmra.mxu1 %vm666_vm1, %v652_v34 }
 0x113   : > { %v653_v38 = vmax.f32 %v615_v37, 0.0 }
 0x115   : > { %1329 = vmatprep.mubr.msk.f32.mxu1 %vm666_vm1, %v653_v38 }
 0x116   : > { %1330 = vmatmul.mubr.msk.f32.gmra.mxu1 %vm666_vm1, %v654_v39 }
 0x19a   : > { %v1286_v6 = vpop.f32.mrf.mxu1 }
 0x19b   : > { %v835_v41 = vadd.f32 %v1286_v6, %v1550_v40 }
 0x19c   : > { %v829_v42 = vpop.f32.mrf.mxu1 }
 0x19d   : > { %990 = vst.msk [vmem:[%s1557_s19 + $0x8] sm:$0xff] %vm988_vm2, %v835_v41  ;;  %v830_v43 = vadd.f32 %v1550_v40, %v829_v42 }
 0x19e   : > { %v1289_v44 = vpop.f32.mrf.mxu1 }
 0x19f   : > { %989 = vst.msk [vmem:[%s1557_s19] sm:$0xff] %vm988_vm2, %v830_v43  ;;  %v845_v45 = vadd.f32 %v1289_v44, %v1550_v40 }
 0x1a0   : > { %v839_v46 = vpop.f32.mrf.mxu1 }
 0x1a1   : > { %992 = vst.msk [vmem:[%s1557_s19 + $0x18] sm:$0xff] %vm988_vm2, %v845_v45  ;;  %v840_v47 = vadd.f32 %v1550_v40, %v839_v46 }
 0x1a2   : > { %v1292_v48 = vpop.f32.mrf.mxu1 }
 0x1a3   : > { %991 = vst.msk [vmem:[%s1557_s19 + $0x10] sm:$0xff] %vm988_vm2, %v840_v47  ;;  %v855_v49 = vadd.f32 %v1292_v48, %v1550_v40 }
 0x1a4   : > { %v849_v50 = vpop.f32.mrf.mxu1 }
 0x1a5   : > { %994 = vst.msk [vmem:[%s1557_s19 + $0x28] sm:$0xff] %vm988_vm2, %v855_v49  ;;  %v850_v51 = vadd.f32 %v1550_v40, %v849_v50 }
 0x1a6   : > { %v1295_v52 = vpop.f32.mrf.mxu1 }
 0x1a7   : > { %993 = vst.msk [vmem:[%s1557_s19 + $0x20] sm:$0xff] %vm988_vm2, %v850_v51  ;;  %v865_v53 = vadd.f32 %v1295_v52, %v1550_v40 }
 0x1a8   : > { %v859_v54 = vpop.f32.mrf.mxu1 }
 0x1a9   : > { %996 = vst.msk [vmem:[%s1557_s19 + $0x38] sm:$0xff] %vm988_vm2, %v865_v53  ;;  %v860_v55 = vadd.f32 %v1550_v40, %v859_v54 }
 0x1aa   : > { %v1298_v56 = vpop.f32.mrf.mxu1 }
 0x1ab   : > { %995 = vst.msk [vmem:[%s1557_s19 + $0x30] sm:$0xff] %vm988_vm2, %v860_v55  ;;  %v875_v57 = vadd.f32 %v1298_v56, %v1550_v40 }
 0x1ac   : > { %v869_v58 = vpop.f32.mrf.mxu1 }
 0x1ad   : > { %998 = vst.msk [vmem:[%s1557_s19 + $0x48] sm:$0xff] %vm988_vm2, %v875_v57  ;;  %v870_v59 = vadd.f32 %v1550_v40, %v869_v58 }
 0x1ae   : > { %v1301_v60 = vpop.f32.mrf.mxu1 }
 0x1af   : > { %997 = vst.msk [vmem:[%s1557_s19 + $0x40] sm:$0xff] %vm988_vm2, %v870_v59  ;;  %v885_v61 = vadd.f32 %v1301_v60, %v1550_v40 }
 0x1b0   : > { %v879_v62 = vpop.f32.mrf.mxu1 }
 0x1b1   : > { %1000 = vst.msk [vmem:[%s1557_s19 + $0x58] sm:$0xff] %vm988_vm2, %v885_v61  ;;  %v880_v63 = vadd.f32 %v1550_v40, %v879_v62 }
 0x1b2   : > { %v1304_v0 = vpop.f32.mrf.mxu1 }
 0x1b3   : > { %999 = vst.msk [vmem:[%s1557_s19 + $0x50] sm:$0xff] %vm988_vm2, %v880_v63  ;;  %v895_v1 = vadd.f32 %v1304_v0, %v1550_v40 }
 0x1b4   : > { %v889_v2 = vpop.f32.mrf.mxu1 }
 0x1b5   : > { %1002 = vst.msk [vmem:[%s1557_s19 + $0x68] sm:$0xff] %vm988_vm2, %v895_v1  ;;  %v890_v3 = vadd.f32 %v1550_v40, %v889_v2 }
 0x1b6   : > { %v1307_v4 = vpop.f32.mrf.mxu1 }
 0x1b7   : > { %1001 = vst.msk [vmem:[%s1557_s19 + $0x60] sm:$0xff] %vm988_vm2, %v890_v3  ;;  %v905_v5 = vadd.f32 %v1307_v4, %v1550_v40 }
 0x1b8   : > { %v899_v7 = vpop.f32.mrf.mxu1 }
 0x1b9   : > { %1004 = vst.msk [vmem:[%s1557_s19 + $0x78] sm:$0xff] %vm988_vm2, %v905_v5  ;;  %v900_v8 = vadd.f32 %v1550_v40, %v899_v7 }
 0x1ba   : > { %v1310_v9 = vpop.f32.mrf.mxu1 }
 0x1bb   : > { %1003 = vst.msk [vmem:[%s1557_s19 + $0x70] sm:$0xff] %vm988_vm2, %v900_v8  ;;  %v915_v10 = vadd.f32 %v1310_v9, %v1550_v40 }
 0x1bc   : > { %v909_v11 = vpop.f32.mrf.mxu1 }
 0x1bd   : > { %1006 = vst.msk [vmem:[%s1557_s19 + $0x88] sm:$0xff] %vm988_vm2, %v915_v10  ;;  %v910_v12 = vadd.f32 %v1550_v40, %v909_v11 }
 0x1be   : > { %v1313_v13 = vpop.f32.mrf.mxu1 }
 0x1bf   : > { %1005 = vst.msk [vmem:[%s1557_s19 + $0x80] sm:$0xff] %vm988_vm2, %v910_v12  ;;  %v925_v14 = vadd.f32 %v1313_v13, %v1550_v40 }
 0x1c0   : > { %v919_v15 = vpop.f32.mrf.mxu1 }
 0x1c1   : > { %1008 = vst.msk [vmem:[%s1557_s19 + $0x98] sm:$0xff] %vm988_vm2, %v925_v14  ;;  %v920_v16 = vadd.f32 %v1550_v40, %v919_v15 }
 0x1c2   : > { %v1316_v17 = vpop.f32.mrf.mxu1 }
 0x1c3   : > { %1007 = vst.msk [vmem:[%s1557_s19 + $0x90] sm:$0xff] %vm988_vm2, %v920_v16  ;;  %v935_v18 = vadd.f32 %v1316_v17, %v1550_v40 }
 0x1c4   : > { %v929_v19 = vpop.f32.mrf.mxu1 }
 0x1c5   : > { %1010 = vst.msk [vmem:[%s1557_s19 + $0xa8] sm:$0xff] %vm988_vm2, %v935_v18  ;;  %v930_v20 = vadd.f32 %v1550_v40, %v929_v19 }
 0x1c6   : > { %v1319_v21 = vpop.f32.mrf.mxu1 }
 0x1c7   : > { %1009 = vst.msk [vmem:[%s1557_s19 + $0xa0] sm:$0xff] %vm988_vm2, %v930_v20  ;;  %v945_v22 = vadd.f32 %v1319_v21, %v1550_v40 }
 0x1c8   : > { %v939_v23 = vpop.f32.mrf.mxu1 }
 0x1c9   : > { %1012 = vst.msk [vmem:[%s1557_s19 + $0xb8] sm:$0xff] %vm988_vm2, %v945_v22  ;;  %v940_v24 = vadd.f32 %v1550_v40, %v939_v23 }
 0x1ca   : > { %v1322_v25 = vpop.f32.mrf.mxu1 }
 0x1cb   : > { %1011 = vst.msk [vmem:[%s1557_s19 + $0xb0] sm:$0xff] %vm988_vm2, %v940_v24  ;;  %v955_v26 = vadd.f32 %v1322_v25, %v1550_v40 }
 0x1cc   : > { %v949_v27 = vpop.f32.mrf.mxu1 }
 0x1cd   : > { %1014 = vst.msk [vmem:[%s1557_s19 + $0xc8] sm:$0xff] %vm988_vm2, %v955_v26  ;;  %v950_v28 = vadd.f32 %v1550_v40, %v949_v27 }
 0x1ce   : > { %v1325_v29 = vpop.f32.mrf.mxu1 }
 0x1cf   : > { %1013 = vst.msk [vmem:[%s1557_s19 + $0xc0] sm:$0xff] %vm988_vm2, %v950_v28  ;;  %v965_v30 = vadd.f32 %v1325_v29, %v1550_v40 }
 0x1d0   : > { %v959_v31 = vpop.f32.mrf.mxu1 }
 0x1d1   : > { %1016 = vst.msk [vmem:[%s1557_s19 + $0xd8] sm:$0xff] %vm988_vm2, %v965_v30  ;;  %v960_v32 = vadd.f32 %v1550_v40, %v959_v31 }
 0x1d2   : > { %v1328_v33 = vpop.f32.mrf.mxu1 }
 0x1d3   : > { %1015 = vst.msk [vmem:[%s1557_s19 + $0xd0] sm:$0xff] %vm988_vm2, %v960_v32  ;;  %v975_v34 = vadd.f32 %v1328_v33, %v1550_v40 }
 0x1d4   : > { %v969_v35 = vpop.f32.mrf.mxu1 }
 0x1d5   : > { %1018 = vst.msk [vmem:[%s1557_s19 + $0xe8] sm:$0xff] %vm988_vm2, %v975_v34  ;;  %v970_v36 = vadd.f32 %v1550_v40, %v969_v35 }
 0x1d6   : > { %v1331_v37 = vpop.f32.mrf.mxu1 }
 0x1d7   : > { %1017 = vst.msk [vmem:[%s1557_s19 + $0xe0] sm:$0xff] %vm988_vm2, %v970_v36  ;;  %v985_v38 = vadd.f32 %v1331_v37, %v1550_v40 }
 0x1d8   : > { %v979_v39 = vpop.f32.mrf.mxu1 }
 0x1d9   : > { %1020 = vst.msk [vmem:[%s1557_s19 + $0xf8] sm:$0xff] %vm988_vm2, %v985_v38  ;;  %v980_v6 = vadd.f32 %v1550_v40, %v979_v39 }
 0x1db   : > { %1019 = vst.msk [vmem:[%s1557_s19 + $0xf0] sm:$0xff] %vm988_vm2, %v980_v6 }
 0x1dc PF: > { %s15_s18 = sadd.s32 1, %s1346_s18  }
 0x1dd   : > { %p12_p4 = scmp.ge.s32.totalorder %s15_s18, 4  }
 0x1df   :  { %14 = sbr.rel (!%p12_p4) target bundleno = 1 (0x1), region = 70 }

</bundles_post_ra>
